<compile_context>
chip_gen: v7x
topology: tpu7x:2x2x1
jax: 0.10.0
libtpu: 0.0.40
codegen_flags: <defaults>
</compile_context>

<pallas_src>
import jax
import jax.numpy as jnp
from jax.experimental import pallas as pl
from jax.experimental.pallas import tpu as pltpu


def _head_kernel(x_ref, w_ref, b_ref, o_ref):
    # Single MXU matmul with f32 accumulation, bias add, cast to out dtype.
    o_ref[...] = (
        jnp.dot(x_ref[...], w_ref[...], preferred_element_type=jnp.float32)
        + b_ref[...]
    ).astype(o_ref.dtype)


def classification_head(feat_out, weight_t, bias, *, out_dtype=jnp.float32):
    """Inference forward of ClassificationHead.

    feat_out: [B, in_ch]   (Dropout(0.5) is identity at inference)
    weight_t: [in_ch, out_dim]  (transposed nn.Linear weight)
    bias:     [out_dim]
    Returns:  [B, out_dim] in `out_dtype` (f32 to match the PyTorch head).
    """
    B, K = feat_out.shape
    K2, N = weight_t.shape
    assert K == K2, "feature dim mismatch"

    # Whole-problem-in-VMEM guard (single-shot kernel, no K/N tiling).
    # Stay well under the smallest scoped-VMEM default across v5e/v6e/v7x.
    out_itemsize = jnp.dtype(out_dtype).itemsize
    vmem_bytes = (
        feat_out.size * feat_out.dtype.itemsize
        + weight_t.size * weight_t.dtype.itemsize
        + N * bias.dtype.itemsize
        + B * N * out_itemsize
    )
    assert vmem_bytes <= 8 * 1024 * 1024, (
        "ClassificationHead operands exceed the VMEM-resident budget; "
        "re-introduce K/N tiling for very large in_ch/out_dim."
    )
    # TODO(synk): K/N-tiled variant (accumulating directly into the f32 output)
    # for vocab-sized out_dim that does not fit VMEM.

    bias2d = bias.reshape(1, N)  # 2-D for a clean (sublane, lane) VMEM layout

    cost = pl.CostEstimate(
        flops=2 * B * K * N,
        transcendentals=0,
        bytes_accessed=vmem_bytes,
    )

    return pl.pallas_call(
        _head_kernel,
        out_shape=jax.ShapeDtypeStruct((B, N), out_dtype),
        in_specs=[
            pl.BlockSpec(memory_space=pltpu.MemorySpace.VMEM),  # x  [B, K]
            pl.BlockSpec(memory_space=pltpu.MemorySpace.VMEM),  # Wt [K, N]
            pl.BlockSpec(memory_space=pltpu.MemorySpace.VMEM),  # b  [1, N]
        ],
        out_specs=pl.BlockSpec(memory_space=pltpu.MemorySpace.VMEM),
        cost_estimate=cost,
    )(feat_out, weight_t, bias2d)


def classification_head_bf16(feat_out, weight_t, bias):
    """Bandwidth-optimized path: bf16 weight + activations, f32 accumulation.

    The kernel is weight-HBM-bandwidth bound at small batch, so halving the
    weight bytes roughly halves the dominant DMA on all TPU generations.
    """
    return classification_head(
        feat_out.astype(jnp.bfloat16),
        weight_t.astype(jnp.bfloat16),
        bias,  # bias stays f32; added after the f32-accumulated dot
        out_dtype=jnp.float32,
    )


if __name__ == "__main__":
    # Small-but-representative shapes consistent with the module defaults.
    B, in_ch, out_dim = 8, 1536, 128

    key = jax.random.PRNGKey(0)
    kx, kw, kb = jax.random.split(key, 3)

    feat_out = jax.random.normal(kx, (B, in_ch), dtype=jnp.float32)
    # nn.Linear-style deterministic init: U(-1/sqrt(in_ch), 1/sqrt(in_ch))
    bound = 1.0 / (in_ch ** 0.5)
    weight = jax.random.uniform(kw, (out_dim, in_ch), jnp.float32, -bound, bound)
    bias = jax.random.uniform(kb, (out_dim,), jnp.float32, -bound, bound)

    weight_t = weight.T  # [in_ch, out_dim]; layout glue outside the kernel

    # --- f32 path (exact semantics of the PyTorch module at inference) ---
    out = classification_head(feat_out, weight_t, bias)
    out = jax.block_until_ready(out)

    ref = feat_out @ weight_t + bias[None, :]
    assert out.shape == (B, out_dim)
    assert jnp.allclose(out, ref, atol=1e-4, rtol=1e-4), "f32 mismatch vs reference"

    # --- bf16-weight path (bandwidth optimization, loose tolerance) ---
    out_bf16 = classification_head_bf16(feat_out, weight_t, bias)
    out_bf16 = jax.block_until_ready(out_bf16)
    assert out_bf16.shape == (B, out_dim)
    assert jnp.allclose(out_bf16, ref, atol=5e-2, rtol=5e-2), "bf16 path mismatch"

    print("KERNEL_OK")
</pallas_src>

<mosaic_0001>
module attributes {stable_mosaic.version = 11 : i64} {
  func.func @_head_kernel(%arg0: memref<8x1536xf32, #tpu.memory_space<vmem>>, %arg1: memref<1536x128xf32, #tpu.memory_space<vmem>>, %arg2: memref<1x128xf32, #tpu.memory_space<vmem>>, %arg3: memref<8x128xf32, #tpu.memory_space<vmem>>) attributes {dimension_semantics = [], scalar_prefetch = 0 : i64, scratch_operands = 0 : i64, tpu.core_type = #tpu.core_type<tc>} {
    %c0 = arith.constant 0 : index
    %c0_0 = arith.constant 0 : index
    %0 = vector.load %arg0[%c0, %c0_0] : memref<8x1536xf32, #tpu.memory_space<vmem>>, vector<8x1536xf32>
    %c0_1 = arith.constant 0 : index
    %c0_2 = arith.constant 0 : index
    %1 = vector.load %arg1[%c0_1, %c0_2] : memref<1536x128xf32, #tpu.memory_space<vmem>>, vector<1536x128xf32>
    %cst = arith.constant dense<0.000000e+00> : vector<8x128xf32>
    %2 = tpu.matmul %0, %1, %cst {dimension_numbers = #tpu.dot_dimension_numbers<[1], [0], [0], [1], [0, 0, 1, 1], [], []>} : vector<8x1536xf32>, vector<1536x128xf32>, vector<8x128xf32> -> vector<8x128xf32>
    %c0_3 = arith.constant 0 : index
    %c0_4 = arith.constant 0 : index
    %3 = vector.load %arg2[%c0_3, %c0_4] : memref<1x128xf32, #tpu.memory_space<vmem>>, vector<1x128xf32>
    %4 = vector.broadcast %3 : vector<1x128xf32> to vector<8x128xf32>
    %5 = arith.addf %2, %4 : vector<8x128xf32>
    %c0_5 = arith.constant 0 : index
    %c0_6 = arith.constant 0 : index
    %6 = vector.load %arg3[%c0_5, %c0_6] : memref<8x128xf32, #tpu.memory_space<vmem>>, vector<8x128xf32>
    tpu.vector_store %arg3[%c0_5, %c0_6], %5 {strides = array<i32>} : memref<8x128xf32, #tpu.memory_space<vmem>>, vector<8x128xf32>,
    return
  }
}

</mosaic_0001>

<bundles_post_ra>
// kernel: tpu_custom_call.1
= control target key start
LH: loop header
LB: loop body
LE: loop exit
PB: predicated region body
PF: predicated region fallthrough
CT: control target
= control target key end

     0   :  { %8 = vsyncpa [#allocation3], 0  ;;  %s1240_s0 = inlined_call_operand.hbm [shape: f32[8,1536], index: 0, kind: input, shape index: {}]   ;;  %s1241_s1 = inlined_call_operand.hbm [shape: f32[1536,128], index: 1, kind: input, shape index: {}]   ;;  %s1242_s2 = inlined_call_operand.vmem [shape: f32[1,128], index: 2, kind: input, shape index: {}]   ;;  %s1243_s3 = inlined_call_operand.hbm [shape: f32[8,128], index: 3, kind: output, shape index: {}]  }
   0x1   :  { %9 = vsyncpa [#allocation6], 0 }
   0x2   :  { %10 = vsyncpa [#allocation4], 0  ;;  %s1169_s12 = smov [#allocation2]   ;;  %s1170_s14 = smov [#allocation5]  }
   0x3   :  { %s17_s13 = sshll.u32 %s1169_s12, 4  ;;  %s26_s15 = sshll.u32 %s1170_s14, 4  ;;  %s18_s13 = int_to_ptr.vmem [resolvable:$true] %s17_s13  ;;  %s1194_s15 = int_to_ptr.vmem [resolvable:$true] %s26_s15 }
   0x4   :  { %s1097_s18 = scalar_lea.hbm %s1240_s0, 1536 }
   0x5   :  { %p1098_p0 = scmp.ne.s32.totalorder %s1240_s0, %s1097_s18  ;;  %p1101_p1 = scmp.lt.u32.totalorder %s1097_s18, %s1240_s0 }
   0x7   :  { %p1103_p2 = pnand %p1101_p1, %p1098_p0 }
   0x9   :  { %1106 = shalt.err (!%p1103_p2)
}
   0xa   :  { %s1107_s23 = scalar_lea.vmem %s18_s13, 1536  ;;  %p1112_p4 = scmp.lt.s32.totalorder %s18_s13, %s18_s13 }
   0xb   :  { %p1108_p3 = scmp.ne.s32.totalorder %s18_s13, %s1107_s23  ;;  %p1113_p5 = scmp.lt.s32.totalorder %s1107_s23, %s1107_s23 }
   0xd   :  { %p1114_p6 = por %p1113_p5, %p1112_p4 }
   0xf   :  { %p1115_p7 = pnand %p1114_p6, %p1108_p3 }
  0x11   :  { %1118 = shalt.err (!%p1115_p7)
}
  0x12   :  { %20 = dma.hbm_to_vmem [thread:$0]  %s1240_s0, 1536, %s18_s13, [#allocation3]  }
  0x13   :  { %s1119_s28 = scalar_lea.hbm %s1241_s1, 24576 }
  0x14   :  { %p1120_p8 = scmp.ne.s32.totalorder %s1241_s1, %s1119_s28  ;;  %p1123_p9 = scmp.lt.u32.totalorder %s1119_s28, %s1241_s1 }
  0x16   :  { %p1125_p10 = pnand %p1123_p9, %p1120_p8 }
  0x18   :  { %1128 = shalt.err (!%p1125_p10)
}
  0x19   :  { %s1129_s6 = scalar_lea.vmem %s1194_s15, 24576  ;;  %p1134_p12 = scmp.lt.s32.totalorder %s1194_s15, %s1194_s15 }
  0x1a   :  { %p1130_p11 = scmp.ne.s32.totalorder %s1194_s15, %s1129_s6  ;;  %p1135_p13 = scmp.lt.s32.totalorder %s1129_s6, %s1129_s6 }
  0x1c   :  { %p1136_p0 = por %p1135_p13, %p1134_p12 }
  0x1e   :  { %p1137_p1 = pnand %p1136_p0, %p1130_p11 }
  0x20   :  { %1140 = shalt.err (!%p1137_p1)
}
  0x21   :  { %s1171_s0 = smov 128   ;;  %s1172_s7 = smov 8  }
  0x22   :  { %32 = dma.hbm_to_vmem [thread:$0]  %s1241_s1, 24576, %s1194_s15, [#allocation6], %s1171_s0, %s1171_s0, %s1172_s7  }
  0x23   :  { %1163 = dma.done.wait [#allocation3], 1536  }
  0x24   :  { %1164 = vsyncadd [#allocation3], 4294965760 }
  0x25   :  { %1165 = dma.done.wait [#allocation6], 24576  }
  0x26   :  { %1166 = vsyncadd [#allocation6], 4294942720  ;;  %v69_v0 = vld [vmem:[#allocation5 + $0x80] sm:$0xff]  ;;  %v70_v1 = vld [vmem:[#allocation5 + $0x88] sm:$0xff] }
  0x27   :  { %v53_v2 = vld [vmem:[#allocation5] sm:$0xff]  ;;  %v900_v3 = vpack.c.bf16 %v70_v1, %v69_v0  ;;  %v54_v4 = vld [vmem:[#allocation5 + $0x8] sm:$0xff]  ;;  %v71_v11 = vld [vmem:[#allocation5 + $0x90] sm:$0xff] }
  0x28   :  { %v101_v5 = vld [vmem:[#allocation5 + $0x180] sm:$0xff]  ;;  %v102_v6 = vld [vmem:[#allocation5 + $0x188] sm:$0xff]  ;;  %v902_v7 = vpack.c.bf16 %v54_v4, %v53_v2  ;;  %v72_v13 = vld [vmem:[#allocation5 + $0x98] sm:$0xff] }
  0x29   :  { %v932_v8 = vpack.c.bf16 %v102_v6, %v101_v5  ;;  %v85_v9 = vld [vmem:[#allocation5 + $0x100] sm:$0xff]  ;;  %v86_v10 = vld [vmem:[#allocation5 + $0x108] sm:$0xff]  ;;  %901 = vmatprep.subr.bf16.mxu0 %v900_v3  ;;  %v55_v14 = vld [vmem:[#allocation5 + $0x10] sm:$0xff]  ;;  %v904_v16 = vpack.c.bf16 %v72_v13, %v71_v11 }
  0x2a   :  { %v934_v12 = vpack.c.bf16 %v86_v10, %v85_v9  ;;  %v56_v15 = vld [vmem:[#allocation5 + $0x18] sm:$0xff]  ;;  %903 = vmatpush3.bf16.msra.mxu0 %v902_v7  ;;  %v103_v18 = vld [vmem:[#allocation5 + $0x190] sm:$0xff]  ;;  %v73_v23 = vld [vmem:[#allocation5 + $0xa0] sm:$0xff] }
  0x2b   :  { %933 = vmatprep.subr.bf16.mxu1 %v932_v8  ;;  %v906_v17 = vpack.c.bf16 %v56_v15, %v55_v14  ;;  %v104_v19 = vld [vmem:[#allocation5 + $0x198] sm:$0xff]  ;;  %v87_v20 = vld [vmem:[#allocation5 + $0x110] sm:$0xff]  ;;  %v74_v24 = vld [vmem:[#allocation5 + $0xa8] sm:$0xff]  ;;  %905 = vmatprep.subr.bf16.mxu0 %v904_v16 }
  0x2c   :  { %935 = vmatpush3.bf16.msra.mxu1 %v934_v12  ;;  %v936_v21 = vpack.c.bf16 %v104_v19, %v103_v18  ;;  %v88_v22 = vld [vmem:[#allocation5 + $0x118] sm:$0xff]  ;;  %v908_v26 = vpack.c.bf16 %v74_v24, %v73_v23  ;;  %v57_v27 = vld [vmem:[#allocation5 + $0x20] sm:$0xff]  ;;  %v58_v28 = vld [vmem:[#allocation5 + $0x28] sm:$0xff] }
  0x2d   :  { %v938_v25 = vpack.c.bf16 %v88_v22, %v87_v20  ;;  %v105_v29 = vld [vmem:[#allocation5 + $0x1a0] sm:$0xff]  ;;  %v106_v30 = vld [vmem:[#allocation5 + $0x1a8] sm:$0xff]  ;;  %v910_v33 = vpack.c.bf16 %v58_v28, %v57_v27  ;;  %v75_v35 = vld [vmem:[#allocation5 + $0xb0] sm:$0xff] }
  0x2e   :  { %937 = vmatprep.subr.bf16.mxu1 %v936_v21  ;;  %v89_v31 = vld [vmem:[#allocation5 + $0x120] sm:$0xff]  ;;  %v90_v32 = vld [vmem:[#allocation5 + $0x128] sm:$0xff]  ;;  %907 = vmatpush3.bf16.msra.mxu0 %v906_v17  ;;  %v940_v34 = vpack.c.bf16 %v106_v30, %v105_v29  ;;  %v76_v36 = vld [vmem:[#allocation5 + $0xb8] sm:$0xff] }
  0x2f   :  { %v59_v37 = vld [vmem:[#allocation5 + $0x30] sm:$0xff]  ;;  %909 = vmatprep.subr.bf16.mxu0 %v908_v26  ;;  %v942_v38 = vpack.c.bf16 %v90_v32, %v89_v31  ;;  %v912_v39 = vpack.c.bf16 %v76_v36, %v75_v35  ;;  %v60_v40 = vld [vmem:[#allocation5 + $0x38] sm:$0xff]  ;;  %v77_v46 = vld [vmem:[#allocation5 + $0xc0] sm:$0xff] }
  0x30   :  { %939 = vmatpush3.bf16.msra.mxu1 %v938_v25  ;;  %v107_v41 = vld [vmem:[#allocation5 + $0x1b0] sm:$0xff]  ;;  %v108_v42 = vld [vmem:[#allocation5 + $0x1b8] sm:$0xff]  ;;  %v78_v47 = vld [vmem:[#allocation5 + $0xc8] sm:$0xff]  ;;  %v914_v48 = vpack.c.bf16 %v60_v40, %v59_v37 }
  0x31   :  { %941 = vmatprep.subr.bf16.mxu1 %v940_v34  ;;  %v944_v43 = vpack.c.bf16 %v108_v42, %v107_v41  ;;  %v91_v44 = vld [vmem:[#allocation5 + $0x130] sm:$0xff]  ;;  %v92_v45 = vld [vmem:[#allocation5 + $0x138] sm:$0xff]  ;;  %v109_v49 = vld [vmem:[#allocation5 + $0x1c0] sm:$0xff]  ;;  %v916_v52 = vpack.c.bf16 %v78_v47, %v77_v46 }
  0x32   :  { %911 = vmatpush3.bf16.msra.mxu0 %v910_v33  ;;  %v110_v50 = vld [vmem:[#allocation5 + $0x1c8] sm:$0xff]  ;;  %v946_v51 = vpack.c.bf16 %v92_v45, %v91_v44  ;;  %v61_v53 = vld [vmem:[#allocation5 + $0x40] sm:$0xff]  ;;  %v79_v58 = vld [vmem:[#allocation5 + $0xd0] sm:$0xff] }
  0x33   :  { %913 = vmatprep.subr.bf16.mxu0 %v912_v39  ;;  %v62_v54 = vld [vmem:[#allocation5 + $0x48] sm:$0xff]  ;;  %v93_v55 = vld [vmem:[#allocation5 + $0x140] sm:$0xff]  ;;  %v948_v56 = vpack.c.bf16 %v110_v50, %v109_v49  ;;  %v80_v59 = vld [vmem:[#allocation5 + $0xd8] sm:$0xff] }
  0x34   :  { %943 = vmatpush3.bf16.msra.mxu1 %v942_v38  ;;  %v94_v57 = vld [vmem:[#allocation5 + $0x148] sm:$0xff]  ;;  %v111_v60 = vld [vmem:[#allocation5 + $0x1d0] sm:$0xff]  ;;  %v112_v61 = vld [vmem:[#allocation5 + $0x1d8] sm:$0xff]  ;;  %v918_v62 = vpack.c.bf16 %v62_v54, %v61_v53  ;;  %v920_v0 = vpack.c.bf16 %v80_v59, %v79_v58 }
  0x35   :  { %945 = vmatprep.subr.bf16.mxu1 %v944_v43  ;;  %v950_v63 = vpack.c.bf16 %v94_v57, %v93_v55  ;;  %v63_v1 = vld [vmem:[#allocation5 + $0x50] sm:$0xff]  ;;  %v64_v2 = vld [vmem:[#allocation5 + $0x58] sm:$0xff]  ;;  %v952_v4 = vpack.c.bf16 %v112_v61, %v111_v60  ;;  %v81_v6 = vld [vmem:[#allocation5 + $0xe0] sm:$0xff] }
  0x36   :  { %915 = vmatpush3.bf16.msra.mxu0 %v914_v48  ;;  %v95_v3 = vld [vmem:[#allocation5 + $0x150] sm:$0xff]  ;;  %v96_v5 = vld [vmem:[#allocation5 + $0x158] sm:$0xff]  ;;  %v82_v7 = vld [vmem:[#allocation5 + $0xe8] sm:$0xff]  ;;  %v922_v10 = vpack.c.bf16 %v64_v2, %v63_v1 }
  0x37   :  { %917 = vmatprep.subr.bf16.mxu0 %v916_v52  ;;  %v113_v8 = vld [vmem:[#allocation5 + $0x1e0] sm:$0xff]  ;;  %v114_v9 = vld [vmem:[#allocation5 + $0x1e8] sm:$0xff]  ;;  %v954_v13 = vpack.c.bf16 %v96_v5, %v95_v3  ;;  %v924_v14 = vpack.c.bf16 %v82_v7, %v81_v6  ;;  %v83_v19 = vld [vmem:[#allocation5 + $0xf0] sm:$0xff] }
  0x38   :  { %947 = vmatpush3.bf16.msra.mxu1 %v946_v51  ;;  %v65_v11 = vld [vmem:[#allocation5 + $0x60] sm:$0xff]  ;;  %v66_v12 = vld [vmem:[#allocation5 + $0x68] sm:$0xff]  ;;  %v956_v18 = vpack.c.bf16 %v114_v9, %v113_v8  ;;  %v84_v20 = vld [vmem:[#allocation5 + $0xf8] sm:$0xff] }
  0x39   :  { %949 = vmatprep.subr.bf16.mxu1 %v948_v56  ;;  %v97_v15 = vld [vmem:[#allocation5 + $0x160] sm:$0xff]  ;;  %v98_v16 = vld [vmem:[#allocation5 + $0x168] sm:$0xff]  ;;  %v44_v21 = vld [vmem:[#allocation2 + $0x18] sm:$0xff]  ;;  %v926_v24 = vpack.c.bf16 %v66_v12, %v65_v11  ;;  %v928_v26 = vpack.c.bf16 %v84_v20, %v83_v19 }
  0x3a   :  { %919 = vmatpush3.bf16.msra.mxu0 %v918_v62  ;;  %v42_v17 = vld [vmem:[#allocation2 + $0x8] sm:$0xff]  ;;  %v115_v22 = vld [vmem:[#allocation5 + $0x1f0] sm:$0xff]  ;;  %v116_v23 = vld [vmem:[#allocation5 + $0x1f8] sm:$0xff]  ;;  %386 = vmatprep.mubr.f32.mxu1 %v44_v21  ;;  %v958_v25 = vpack.c.bf16 %v98_v16, %v97_v15 }
  0x3b   :  { %921 = vmatprep.subr.bf16.mxu0 %v920_v0  ;;  %316 = vmatprep.mubr.f32.mxu0 %v42_v17  ;;  %v67_v27 = vld [vmem:[#allocation5 + $0x70] sm:$0xff]  ;;  %v68_v28 = vld [vmem:[#allocation5 + $0x78] sm:$0xff]  ;;  %v960_v30 = vpack.c.bf16 %v116_v23, %v115_v22  ;;  %v133_v32 = vld [vmem:[#allocation5 + $0x280] sm:$0xff] }
  0x3c   :  { %951 = vmatpush3.bf16.msra.mxu1 %v950_v63  ;;  %v99_v29 = vld [vmem:[#allocation5 + $0x170] sm:$0xff]  ;;  %v100_v31 = vld [vmem:[#allocation5 + $0x178] sm:$0xff]  ;;  %v134_v33 = vld [vmem:[#allocation5 + $0x288] sm:$0xff]  ;;  %v930_v36 = vpack.c.bf16 %v68_v28, %v67_v27 }
  0x3d   :  { %953 = vmatprep.subr.bf16.mxu1 %v952_v4  ;;  %v165_v34 = vld [vmem:[#allocation5 + $0x380] sm:$0xff]  ;;  %v166_v35 = vld [vmem:[#allocation5 + $0x388] sm:$0xff]  ;;  %v962_v37 = vpack.c.bf16 %v100_v31, %v99_v29  ;;  %v964_v38 = vpack.c.bf16 %v134_v33, %v133_v32  ;;  %v135_v44 = vld [vmem:[#allocation5 + $0x290] sm:$0xff] }
  0x3e   :  { %923 = vmatpush3.bf16.msra.mxu0 %v922_v10  ;;  %v117_v39 = vld [vmem:[#allocation5 + $0x200] sm:$0xff]  ;;  %v118_v40 = vld [vmem:[#allocation5 + $0x208] sm:$0xff]  ;;  %v996_v42 = vpack.c.bf16 %v166_v35, %v165_v34  ;;  %v136_v45 = vld [vmem:[#allocation5 + $0x298] sm:$0xff] }
  0x3f   :  { %925 = vmatprep.subr.bf16.mxu0 %v924_v14  ;;  %v149_v41 = vld [vmem:[#allocation5 + $0x300] sm:$0xff]  ;;  %v150_v43 = vld [vmem:[#allocation5 + $0x308] sm:$0xff]  ;;  %v167_v46 = vld [vmem:[#allocation5 + $0x390] sm:$0xff]  ;;  %v966_v49 = vpack.c.bf16 %v118_v40, %v117_v39  ;;  %v968_v52 = vpack.c.bf16 %v136_v45, %v135_v44 }
  0x40   :  { %955 = vmatpush3.bf16.msra.mxu1 %v954_v13  ;;  %v168_v47 = vld [vmem:[#allocation5 + $0x398] sm:$0xff]  ;;  %v41_v48 = vld [vmem:[#allocation2] sm:$0xff]  ;;  %v43_v50 = vld [vmem:[#allocation2 + $0x10] sm:$0xff]  ;;  %v998_v51 = vpack.c.bf16 %v150_v43, %v149_v41 }
  0x41   :  { %957 = vmatprep.subr.bf16.mxu1 %v956_v18  ;;  %v119_v53 = vld [vmem:[#allocation5 + $0x210] sm:$0xff]  ;;  %v120_v54 = vld [vmem:[#allocation5 + $0x218] sm:$0xff]  ;;  %v1000_v56 = vpack.c.bf16 %v168_v47, %v167_v46  ;;  %v137_v58 = vld [vmem:[#allocation5 + $0x2a0] sm:$0xff] }
  0x42   :  { %927 = vmatpush3.bf16.msra.mxu0 %v926_v24  ;;  %v151_v55 = vld [vmem:[#allocation5 + $0x310] sm:$0xff]  ;;  %v152_v57 = vld [vmem:[#allocation5 + $0x318] sm:$0xff]  ;;  %v138_v59 = vld [vmem:[#allocation5 + $0x2a8] sm:$0xff]  ;;  %v970_v62 = vpack.c.bf16 %v120_v54, %v119_v53 }
  0x43   :  { %929 = vmatprep.subr.bf16.mxu0 %v928_v26  ;;  %v169_v60 = vld [vmem:[#allocation5 + $0x3a0] sm:$0xff]  ;;  %v170_v61 = vld [vmem:[#allocation5 + $0x3a8] sm:$0xff]  ;;  %v1002_v63 = vpack.c.bf16 %v152_v57, %v151_v55  ;;  %v972_v0 = vpack.c.bf16 %v138_v59, %v137_v58  ;;  %v139_v6 = vld [vmem:[#allocation5 + $0x2b0] sm:$0xff] }
  0x44   :  { %959 = vmatpush3.bf16.msra.mxu1 %v958_v25  ;;  %v121_v1 = vld [vmem:[#allocation5 + $0x220] sm:$0xff]  ;;  %v122_v2 = vld [vmem:[#allocation5 + $0x228] sm:$0xff]  ;;  %v1004_v4 = vpack.c.bf16 %v170_v61, %v169_v60  ;;  %v140_v7 = vld [vmem:[#allocation5 + $0x2b8] sm:$0xff] }
  0x45   :  { %961 = vmatprep.subr.bf16.mxu1 %v960_v30  ;;  %v153_v3 = vld [vmem:[#allocation5 + $0x320] sm:$0xff]  ;;  %v154_v5 = vld [vmem:[#allocation5 + $0x328] sm:$0xff]  ;;  %v171_v8 = vld [vmem:[#allocation5 + $0x3b0] sm:$0xff]  ;;  %v974_v10 = vpack.c.bf16 %v122_v2, %v121_v1  ;;  %v976_v12 = vpack.c.bf16 %v140_v7, %v139_v6 }
  0x46   :  { %931 = vmatpush3.bf16.msra.mxu0 %v930_v36  ;;  %v172_v9 = vld [vmem:[#allocation5 + $0x3b8] sm:$0xff]  ;;  %v1006_v11 = vpack.c.bf16 %v154_v5, %v153_v3  ;;  %v123_v13 = vld [vmem:[#allocation5 + $0x230] sm:$0xff]  ;;  %v141_v18 = vld [vmem:[#allocation5 + $0x2c0] sm:$0xff] }
  0x47   :  { %965 = vmatprep.subr.bf16.mxu0 %v964_v38  ;;  %v124_v14 = vld [vmem:[#allocation5 + $0x238] sm:$0xff]  ;;  %v155_v15 = vld [vmem:[#allocation5 + $0x330] sm:$0xff]  ;;  %v1008_v16 = vpack.c.bf16 %v172_v9, %v171_v8  ;;  %v142_v19 = vld [vmem:[#allocation5 + $0x2c8] sm:$0xff] }
  0x48   :  { %963 = vmatpush3.bf16.msra.mxu1 %v962_v37  ;;  %v156_v17 = vld [vmem:[#allocation5 + $0x338] sm:$0xff]  ;;  %v173_v20 = vld [vmem:[#allocation5 + $0x3c0] sm:$0xff]  ;;  %v174_v21 = vld [vmem:[#allocation5 + $0x3c8] sm:$0xff]  ;;  %v978_v22 = vpack.c.bf16 %v124_v14, %v123_v13  ;;  %v980_v26 = vpack.c.bf16 %v142_v19, %v141_v18 }
  0x49   :  { %997 = vmatprep.subr.bf16.mxu1 %v996_v42  ;;  %317 = vmatmul.mubr.f32.vlgmr.msra.gmra.mrb[0].mxu0 %v41_v48  ;;  %v125_v23 = vld [vmem:[#allocation5 + $0x240] sm:$0xff]  ;;  %v46_v24 = vld [vmem:[#allocation2 + $0x28] sm:$0xff]  ;;  %v1010_v25 = vpack.c.bf16 %v156_v17, %v155_v15  ;;  %v48_v29 = vld [vmem:[#allocation2 + $0x38] sm:$0xff]  ;;  %v1012_v30 = vpack.c.bf16 %v174_v21, %v173_v20 }
  0x4a   :  { %967 = vmatpush3.bf16.msra.mxu0 %v966_v49  ;;  %v126_v27 = vld [vmem:[#allocation5 + $0x248] sm:$0xff]  ;;  %v157_v28 = vld [vmem:[#allocation5 + $0x340] sm:$0xff]  ;;  %v143_v32 = vld [vmem:[#allocation5 + $0x2d0] sm:$0xff]  ;;  %456 = vmatprep.mubr.f32.mxu0 %v46_v24 }
  0x4b   :  { %387 = vmatmul.mubr.f32.vlgmr.msra.gmra.mrb[0].mxu1 %v43_v50  ;;  %969 = vmatprep.subr.bf16.mxu0 %v968_v52  ;;  %v158_v31 = vld [vmem:[#allocation5 + $0x348] sm:$0xff]  ;;  %v144_v33 = vld [vmem:[#allocation5 + $0x2d8] sm:$0xff]  ;;  %v175_v34 = vld [vmem:[#allocation5 + $0x3d0] sm:$0xff]  ;;  %v982_v36 = vpack.c.bf16 %v126_v27, %v125_v23 }
  0x4c   :  { %999 = vmatpush3.bf16.msra.mxu1 %v998_v51  ;;  %v176_v35 = vld [vmem:[#allocation5 + $0x3d8] sm:$0xff]  ;;  %526 = vmatprep.mubr.f32.mxu1 %v48_v29  ;;  %v1014_v37 = vpack.c.bf16 %v158_v31, %v157_v28  ;;  %v984_v38 = vpack.c.bf16 %v144_v33, %v143_v32  ;;  %v127_v39 = vld [vmem:[#allocation5 + $0x250] sm:$0xff]  ;;  %v145_v44 = vld [vmem:[#allocation5 + $0x2e0] sm:$0xff] }
  0x4d   :  { %1001 = vmatprep.subr.bf16.mxu1 %v1000_v56  ;;  %v128_v40 = vld [vmem:[#allocation5 + $0x258] sm:$0xff]  ;;  %v159_v41 = vld [vmem:[#allocation5 + $0x350] sm:$0xff]  ;;  %v1016_v42 = vpack.c.bf16 %v176_v35, %v175_v34  ;;  %v146_v45 = vld [vmem:[#allocation5 + $0x2e8] sm:$0xff] }
  0x4e   :  { %971 = vmatpush3.bf16.msra.mxu0 %v970_v62  ;;  %v160_v43 = vld [vmem:[#allocation5 + $0x358] sm:$0xff]  ;;  %v177_v46 = vld [vmem:[#allocation5 + $0x3e0] sm:$0xff]  ;;  %v178_v47 = vld [vmem:[#allocation5 + $0x3e8] sm:$0xff]  ;;  %v986_v48 = vpack.c.bf16 %v128_v40, %v127_v39  ;;  %v988_v50 = vpack.c.bf16 %v146_v45, %v145_v44 }
  0x4f   :  { %973 = vmatprep.subr.bf16.mxu0 %v972_v0  ;;  %v1018_v49 = vpack.c.bf16 %v160_v43, %v159_v41  ;;  %v129_v51 = vld [vmem:[#allocation5 + $0x260] sm:$0xff]  ;;  %v130_v52 = vld [vmem:[#allocation5 + $0x268] sm:$0xff]  ;;  %v1020_v54 = vpack.c.bf16 %v178_v47, %v177_v46  ;;  %v147_v56 = vld [vmem:[#allocation5 + $0x2f0] sm:$0xff] }
  0x50   :  { %1003 = vmatpush3.bf16.msra.mxu1 %v1002_v63  ;;  %v161_v53 = vld [vmem:[#allocation5 + $0x360] sm:$0xff]  ;;  %v162_v55 = vld [vmem:[#allocation5 + $0x368] sm:$0xff]  ;;  %v148_v57 = vld [vmem:[#allocation5 + $0x2f8] sm:$0xff]  ;;  %v990_v60 = vpack.c.bf16 %v130_v52, %v129_v51 }
  0x51   :  { %1005 = vmatprep.subr.bf16.mxu1 %v1004_v4  ;;  %v179_v58 = vld [vmem:[#allocation5 + $0x3f0] sm:$0xff]  ;;  %v180_v59 = vld [vmem:[#allocation5 + $0x3f8] sm:$0xff]  ;;  %v1022_v61 = vpack.c.bf16 %v162_v55, %v161_v53  ;;  %v992_v62 = vpack.c.bf16 %v148_v57, %v147_v56  ;;  %v197_v4 = vld [vmem:[#allocation5 + $0x480] sm:$0xff] }
  0x52   :  { %975 = vmatpush3.bf16.msra.mxu0 %v974_v10  ;;  %v131_v63 = vld [vmem:[#allocation5 + $0x270] sm:$0xff]  ;;  %v132_v0 = vld [vmem:[#allocation5 + $0x278] sm:$0xff]  ;;  %v1024_v2 = vpack.c.bf16 %v180_v59, %v179_v58  ;;  %v198_v5 = vld [vmem:[#allocation5 + $0x488] sm:$0xff] }
  0x53   :  { %977 = vmatprep.subr.bf16.mxu0 %v976_v12  ;;  %v163_v1 = vld [vmem:[#allocation5 + $0x370] sm:$0xff]  ;;  %v164_v3 = vld [vmem:[#allocation5 + $0x378] sm:$0xff]  ;;  %v229_v6 = vld [vmem:[#allocation5 + $0x580] sm:$0xff]  ;;  %v994_v8 = vpack.c.bf16 %v132_v0, %v131_v63  ;;  %v1028_v10 = vpack.c.bf16 %v198_v5, %v197_v4 }
  0x54   :  { %1007 = vmatpush3.bf16.msra.mxu1 %v1006_v11  ;;  %v230_v7 = vld [vmem:[#allocation5 + $0x588] sm:$0xff]  ;;  %v1026_v9 = vpack.c.bf16 %v164_v3, %v163_v1  ;;  %v181_v11 = vld [vmem:[#allocation5 + $0x400] sm:$0xff]  ;;  %v200_v17 = vld [vmem:[#allocation5 + $0x498] sm:$0xff] }
  0x55   :  { %1009 = vmatprep.subr.bf16.mxu1 %v1008_v16  ;;  %v182_v12 = vld [vmem:[#allocation5 + $0x408] sm:$0xff]  ;;  %v213_v13 = vld [vmem:[#allocation5 + $0x500] sm:$0xff]  ;;  %v1060_v14 = vpack.c.bf16 %v230_v7, %v229_v6  ;;  %v199_v16 = vld [vmem:[#allocation5 + $0x490] sm:$0xff] }
  0x56   :  { %979 = vmatpush3.bf16.msra.mxu0 %v978_v22  ;;  %v214_v15 = vld [vmem:[#allocation5 + $0x508] sm:$0xff]  ;;  %v231_v18 = vld [vmem:[#allocation5 + $0x590] sm:$0xff]  ;;  %v232_v19 = vld [vmem:[#allocation5 + $0x598] sm:$0xff]  ;;  %v1030_v21 = vpack.c.bf16 %v182_v12, %v181_v11  ;;  %v1032_v24 = vpack.c.bf16 %v200_v17, %v199_v16 }
  0x57   :  { %981 = vmatprep.subr.bf16.mxu0 %v980_v26  ;;  %v45_v20 = vld [vmem:[#allocation2 + $0x20] sm:$0xff]  ;;  %v47_v22 = vld [vmem:[#allocation2 + $0x30] sm:$0xff]  ;;  %v1062_v23 = vpack.c.bf16 %v214_v15, %v213_v13  ;;  %v184_v26 = vld [vmem:[#allocation5 + $0x418] sm:$0xff]  ;;  %v1064_v28 = vpack.c.bf16 %v232_v19, %v231_v18 }
  0x58   :  { %1011 = vmatpush3.bf16.msra.mxu1 %v1010_v25  ;;  %v183_v25 = vld [vmem:[#allocation5 + $0x410] sm:$0xff]  ;;  %v216_v29 = vld [vmem:[#allocation5 + $0x518] sm:$0xff]  ;;  %v202_v31 = vld [vmem:[#allocation5 + $0x4a8] sm:$0xff] }
  0x59   :  { %1013 = vmatprep.subr.bf16.mxu1 %v1012_v30  ;;  %v215_v27 = vld [vmem:[#allocation5 + $0x510] sm:$0xff]  ;;  %v201_v30 = vld [vmem:[#allocation5 + $0x4a0] sm:$0xff]  ;;  %v234_v33 = vld [vmem:[#allocation5 + $0x5a8] sm:$0xff]  ;;  %v1034_v35 = vpack.c.bf16 %v184_v26, %v183_v25 }
  0x5a   :  { %983 = vmatpush3.bf16.msra.mxu0 %v982_v36  ;;  %v233_v32 = vld [vmem:[#allocation5 + $0x5a0] sm:$0xff]  ;;  %v50_v34 = vld [vmem:[#allocation2 + $0x48] sm:$0xff]  ;;  %v52_v36 = vld [vmem:[#allocation2 + $0x58] sm:$0xff] }
  0x5b   :  { %985 = vmatprep.subr.bf16.mxu0 %v984_v38  ;;  %v1036_v38 = vpack.c.bf16 %v202_v31, %v201_v30  ;;  %v185_v39 = vld [vmem:[#allocation5 + $0x420] sm:$0xff]  ;;  %v186_v40 = vld [vmem:[#allocation5 + $0x428] sm:$0xff]  ;;  %v203_v44 = vld [vmem:[#allocation5 + $0x4b0] sm:$0xff] }
  0x5c   :  { %1015 = vmatpush3.bf16.msra.mxu1 %v1014_v37  ;;  %v1066_v37 = vpack.c.bf16 %v216_v29, %v215_v27  ;;  %v217_v41 = vld [vmem:[#allocation5 + $0x520] sm:$0xff]  ;;  %v218_v43 = vld [vmem:[#allocation5 + $0x528] sm:$0xff]  ;;  %v204_v45 = vld [vmem:[#allocation5 + $0x4b8] sm:$0xff] }
  0x5d   :  { %1017 = vmatprep.subr.bf16.mxu1 %v1016_v42  ;;  %v1068_v42 = vpack.c.bf16 %v234_v33, %v233_v32  ;;  %v235_v46 = vld [vmem:[#allocation5 + $0x5b0] sm:$0xff]  ;;  %v236_v47 = vld [vmem:[#allocation5 + $0x5b8] sm:$0xff]  ;;  %v205_v56 = vld [vmem:[#allocation5 + $0x4c0] sm:$0xff] }
  0x5e   :  { %987 = vmatpush3.bf16.msra.mxu0 %v986_v48  ;;  %v1038_v48 = vpack.c.bf16 %v186_v40, %v185_v39  ;;  %v187_v51 = vld [vmem:[#allocation5 + $0x430] sm:$0xff]  ;;  %v188_v52 = vld [vmem:[#allocation5 + $0x438] sm:$0xff]  ;;  %v206_v57 = vld [vmem:[#allocation5 + $0x4c8] sm:$0xff] }
  0x5f   :  { %989 = vmatprep.subr.bf16.mxu0 %v988_v50  ;;  %v1040_v50 = vpack.c.bf16 %v204_v45, %v203_v44  ;;  %v219_v53 = vld [vmem:[#allocation5 + $0x530] sm:$0xff]  ;;  %v220_v55 = vld [vmem:[#allocation5 + $0x538] sm:$0xff]  ;;  %v237_v58 = vld [vmem:[#allocation5 + $0x5c0] sm:$0xff] }
  0x60   :  { %1019 = vmatpush3.bf16.msra.mxu1 %v1018_v49  ;;  %v1070_v49 = vpack.c.bf16 %v218_v43, %v217_v41  ;;  %v238_v59 = vld [vmem:[#allocation5 + $0x5c8] sm:$0xff]  ;;  %v189_v63 = vld [vmem:[#allocation5 + $0x440] sm:$0xff]  ;;  %v207_v4 = vld [vmem:[#allocation5 + $0x4d0] sm:$0xff] }
  0x61   :  { %1021 = vmatprep.subr.bf16.mxu1 %v1020_v54  ;;  %v1072_v54 = vpack.c.bf16 %v236_v47, %v235_v46  ;;  %v190_v0 = vld [vmem:[#allocation5 + $0x448] sm:$0xff]  ;;  %v221_v1 = vld [vmem:[#allocation5 + $0x540] sm:$0xff]  ;;  %v208_v5 = vld [vmem:[#allocation5 + $0x4d8] sm:$0xff] }
  0x62   :  { %991 = vmatpush3.bf16.msra.mxu0 %v990_v60  ;;  %v1042_v60 = vpack.c.bf16 %v188_v52, %v187_v51  ;;  %v222_v3 = vld [vmem:[#allocation5 + $0x548] sm:$0xff]  ;;  %v239_v6 = vld [vmem:[#allocation5 + $0x5d0] sm:$0xff]  ;;  %v240_v7 = vld [vmem:[#allocation5 + $0x5d8] sm:$0xff] }
  0x63   :  { %993 = vmatprep.subr.bf16.mxu0 %v992_v62  ;;  %v1044_v62 = vpack.c.bf16 %v206_v57, %v205_v56  ;;  %v191_v11 = vld [vmem:[#allocation5 + $0x450] sm:$0xff]  ;;  %v192_v12 = vld [vmem:[#allocation5 + $0x458] sm:$0xff]  ;;  %v209_v16 = vld [vmem:[#allocation5 + $0x4e0] sm:$0xff] }
  0x64   :  { %1023 = vmatpush3.bf16.msra.mxu1 %v1022_v61  ;;  %v1074_v61 = vpack.c.bf16 %v220_v55, %v219_v53  ;;  %v223_v13 = vld [vmem:[#allocation5 + $0x550] sm:$0xff]  ;;  %v224_v15 = vld [vmem:[#allocation5 + $0x558] sm:$0xff]  ;;  %v210_v17 = vld [vmem:[#allocation5 + $0x4e8] sm:$0xff] }
  0x65   :  { %1025 = vmatprep.subr.bf16.mxu1 %v1024_v2  ;;  %v1076_v2 = vpack.c.bf16 %v238_v59, %v237_v58  ;;  %v241_v18 = vld [vmem:[#allocation5 + $0x5e0] sm:$0xff]  ;;  %v242_v19 = vld [vmem:[#allocation5 + $0x5e8] sm:$0xff]  ;;  %v212_v29 = vld [vmem:[#allocation5 + $0x4f8] sm:$0xff] }
  0x66   :  { %995 = vmatpush3.bf16.msra.mxu0 %v994_v8  ;;  %v1046_v8 = vpack.c.bf16 %v190_v0, %v189_v63  ;;  %v225_v25 = vld [vmem:[#allocation5 + $0x560] sm:$0xff]  ;;  %v1084_v26 = vpack.c.bf16 %v242_v19, %v241_v18  ;;  %v226_v27 = vld [vmem:[#allocation5 + $0x568] sm:$0xff]  ;;  %v243_v30 = vld [vmem:[#allocation5 + $0x5f0] sm:$0xff] }
  0x67   :  { %1029 = vmatprep.subr.bf16.mxu0 %v1028_v10  ;;  %v1048_v10 = vpack.c.bf16 %v208_v5, %v207_v4  ;;  %v244_v31 = vld [vmem:[#allocation5 + $0x5f8] sm:$0xff]  ;;  %v1086_v33 = vpack.c.bf16 %v226_v27, %v225_v25  ;;  %v51_v43 = vld [vmem:[#allocation2 + $0x50] sm:$0xff]  ;;  %v689_v45 = vld [vmem:[%s1242_s2] ss:$0 sm:$0xff]  ;;  %s1173_s2 = smov [#allocation7]  }
  0x68   :  { %1027 = vmatpush3.bf16.msra.mxu1 %v1026_v9  ;;  %v1078_v9 = vpack.c.bf16 %v222_v3, %v221_v1  ;;  %v228_v39 = vld [vmem:[#allocation5 + $0x578] sm:$0xff]  ;;  %s679_s11 = sshll.u32 %s1173_s2, 4  ;;  %s680_s11 = int_to_ptr.vmem [resolvable:$true] %s679_s11 }
  0x69   :  { %1061 = vmatprep.subr.bf16.mxu1 %v1060_v14  ;;  %457 = vmatmul.mubr.f32.vlgmr.msra.gmra.mrb[2].mxu0 %v45_v20  ;;  %v1080_v14 = vpack.c.bf16 %v240_v7, %v239_v6  ;;  %v1050_v20 = vpack.c.bf16 %v192_v12, %v191_v11  ;;  %s1141_s12 = scalar_lea.vmem %s680_s11, 128  ;;  %p1146_p3 = scmp.lt.s32.totalorder %s680_s11, %s680_s11 }
  0x6a   :  { %1031 = vmatpush3.bf16.msra.mxu0 %v1030_v21  ;;  %596 = vmatprep.mubr.f32.mxu0 %v50_v34  ;;  %v1082_v21 = vpack.c.bf16 %v224_v15, %v223_v13  ;;  %p1142_p2 = scmp.ne.s32.totalorder %s680_s11, %s1141_s12  ;;  %p1147_p4 = scmp.lt.s32.totalorder %s1141_s12, %s1141_s12 }
  0x6b   :  { %527 = vmatmul.mubr.f32.vlgmr.msra.gmra.mrb[2].mxu1 %v47_v22  ;;  %1033 = vmatprep.subr.bf16.mxu0 %v1032_v24  ;;  %v1052_v22 = vpack.c.bf16 %v210_v17, %v209_v16  ;;  %v194_v24 = vld [vmem:[#allocation5 + $0x468] sm:$0xff] }
  0x6c   :  { %1063 = vmatpush3.bf16.msra.mxu1 %v1062_v23  ;;  %666 = vmatprep.mubr.f32.mxu1 %v52_v36  ;;  %v193_v23 = vld [vmem:[#allocation5 + $0x460] sm:$0xff]  ;;  %v196_v36 = vld [vmem:[#allocation5 + $0x478] sm:$0xff]  ;;  %p1148_p5 = por %p1147_p4, %p1146_p3 }
  0x6d   :  { %1065 = vmatprep.subr.bf16.mxu1 %v1064_v28  ;;  %v211_v28 = vld [vmem:[#allocation5 + $0x4f0] sm:$0xff]  ;;  %v1054_v32 = vpack.c.bf16 %v194_v24, %v193_v23 }
  0x6e   :  { %1035 = vmatpush3.bf16.msra.mxu0 %v1034_v35  ;;  %v1056_v34 = vpack.c.bf16 %v212_v29, %v211_v28  ;;  %v195_v35 = vld [vmem:[#allocation5 + $0x470] sm:$0xff]  ;;  %p1149_p6 = pnand %p1148_p5, %p1142_p2 }
  0x6f   :  { %1037 = vmatprep.subr.bf16.mxu0 %v1036_v38  ;;  %v227_v38 = vld [vmem:[#allocation5 + $0x570] sm:$0xff]  ;;  %v1058_v40 = vpack.c.bf16 %v196_v36, %v195_v35 }
  0x70   :  { %1067 = vmatpush3.bf16.msra.mxu1 %v1066_v37  ;;  %v1088_v37 = vpack.c.bf16 %v244_v31, %v243_v30  ;;  %v1090_v41 = vpack.c.bf16 %v228_v39, %v227_v38 }
  0x71   :  { %1069 = vmatprep.subr.bf16.mxu1 %v1068_v42  ;;  %v49_v42 = vld [vmem:[#allocation2 + $0x40] sm:$0xff] }
  0x72   :  { %1039 = vmatpush3.bf16.msra.mxu0 %v1038_v48 }
  0x73   :  { %1041 = vmatprep.subr.bf16.mxu0 %v1040_v50 }
  0x74   :  { %1071 = vmatpush3.bf16.msra.mxu1 %v1070_v49 }
  0x75   :  { %1073 = vmatprep.subr.bf16.mxu1 %v1072_v54 }
  0x76   :  { %1043 = vmatpush3.bf16.msra.mxu0 %v1042_v60 }
  0x77   :  { %1045 = vmatprep.subr.bf16.mxu0 %v1044_v62 }
  0x78   :  { %1075 = vmatpush3.bf16.msra.mxu1 %v1074_v61 }
  0x79   :  { %1077 = vmatprep.subr.bf16.mxu1 %v1076_v2 }
  0x7a   :  { %1047 = vmatpush3.bf16.msra.mxu0 %v1046_v8 }
  0x7b   :  { %1049 = vmatprep.subr.bf16.mxu0 %v1048_v10 }
  0x7c   :  { %1079 = vmatpush3.bf16.msra.mxu1 %v1078_v9 }
  0x7d   :  { %1081 = vmatprep.subr.bf16.mxu1 %v1080_v14 }
  0x7e   :  { %1051 = vmatpush3.bf16.msra.mxu0 %v1050_v20 }
  0x7f   :  { %1053 = vmatprep.subr.bf16.mxu0 %v1052_v22 }
  0x80   :  { %1083 = vmatpush3.bf16.msra.mxu1 %v1082_v21 }
  0x81   :  { %1085 = vmatprep.subr.bf16.mxu1 %v1084_v26 }
  0x82   :  { %1055 = vmatpush3.bf16.msra.mxu0 %v1054_v32 }
  0x83   :  { %1057 = vmatprep.subr.bf16.mxu0 %v1056_v34 }
  0x84   :  { %1087 = vmatpush3.bf16.msra.mxu1 %v1086_v33 }
  0x85   :  { %1089 = vmatprep.subr.bf16.mxu1 %v1088_v37 }
  0x86   :  { %1059 = vmatpush3.bf16.msra.mxu0 %v1058_v40 }
  0x88   :  { %1091 = vmatpush3.bf16.msra.mxu1 %v1090_v41 }
  0x89   :  { %597 = vmatmul.mubr.f32.vlgmr.msra.gmra.mrb[4].mxu0 %v49_v42 }
  0x8b   :  { %667 = vmatmul.mubr.f32.vlgmr.msra.gmra.mrb[4].mxu1 %v51_v43 }
 0x11c   :  { %v722_v44 = vpop.f32.mrb[0].mxu0 }
 0x11d   :  { %v723_v46 = vpop.f32.mrb[1].mxu0 }
 0x11e   :  { %v757_v47 = vpop.f32.mrb[0].mxu1  ;;  %v724_v48 = vadd.f32 %v723_v46, %v722_v44 }
 0x11f   :  { %v758_v49 = vpop.f32.mrb[1].mxu1 }
 0x120   :  { %v759_v50 = vadd.f32 %v758_v49, %v757_v47  ;;  %v319_v51 = vadd.f32 %v724_v48, %v689_v45 }
 0x122   :  { %v389_v52 = vadd.f32 %v759_v50, %v319_v51 }
 0x13c   :  { %v792_v53 = vpop.f32.mrb[2].mxu0 }
 0x13d   :  { %v793_v54 = vpop.f32.mrb[3].mxu0 }
 0x13e   :  { %v827_v55 = vpop.f32.mrb[2].mxu1  ;;  %v794_v56 = vadd.f32 %v793_v54, %v792_v53 }
 0x13f   :  { %v828_v57 = vpop.f32.mrb[3].mxu1 }
 0x140   :  { %v829_v58 = vadd.f32 %v828_v57, %v827_v55  ;;  %v459_v59 = vadd.f32 %v794_v56, %v389_v52 }
 0x142   :  { %v529_v60 = vadd.f32 %v829_v58, %v459_v59 }
 0x15c   :  { %v862_v61 = vpop.f32.mrb[4].mxu0 }
 0x15d   :  { %v863_v62 = vpop.f32.mrb[5].mxu0 }
 0x15e   :  { %v897_v63 = vpop.f32.mrb[4].mxu1  ;;  %v864_v0 = vadd.f32 %v863_v62, %v862_v61 }
 0x15f   :  { %v898_v1 = vpop.f32.mrb[5].mxu1 }
 0x160   :  { %v899_v2 = vadd.f32 %v898_v1, %v897_v63  ;;  %v599_v3 = vadd.f32 %v864_v0, %v529_v60 }
 0x162   :  { %v669_v4 = vadd.f32 %v899_v2, %v599_v3 }
 0x164   :  { %672 = vst [vmem:[#allocation7] sm:$0xff] %v669_v4 }
 0x165   :  { %1152 = shalt.err (!%p1149_p6)
}
 0x166   :  { %s1153_s15 = scalar_lea.hbm %s1243_s3, 128 }
 0x167   :  { %p1154_p7 = scmp.ne.s32.totalorder %s1243_s3, %s1153_s15  ;;  %p1157_p8 = scmp.lt.u32.totalorder %s1153_s15, %s1243_s3 }
 0x169   :  { %p1159_p9 = pnand %p1157_p8, %p1154_p7 }
 0x16b   :  { %1162 = shalt.err (!%p1159_p9)
}
 0x16c   :  { %682 = dma.vmem_to_hbm [thread:$0]  %s680_s11, 128, %s1243_s3, [#allocation4]  }
 0x16d   :  { %1167 = dma.done.wait [#allocation4], 128  }
 0x16e   :  { %1168 = vsyncadd [#allocation4], 4294967168 }
 0x16f   :  { %686 = vsyncpa [#allocation3], 1 }
 0x170   :  { %687 = vsyncpa [#allocation6], 1 }
 0x171   :  { %688 = vsyncpa [#allocation4], 1 }

</bundles_post_ra>
